<compile_context>
chip_gen: v5e
topology: v5e:2x2
jax: 0.10.0
libtpu: 0.0.40
codegen_flags: <defaults>
</compile_context>

<pallas_src>
import functools

import jax
import jax.numpy as jnp
from jax.experimental import pallas as pl
from jax.experimental.pallas import tpu as pltpu

_LANES = 128
_SUBLANES = 8


def _round_up(a, b):
    return -(-a // b) * b


def _mse_partial_kernel(x_ref, t_ref, acc_ref, *, inv_total, inner, tr,
                        valid_rows, need_mask):
    # x_ref, t_ref: (tr, 128) VMEM tiles of the flattened input / target.
    # acc_ref:      (1, 8, 128) f32 VMEM output block, resident across the
    #               inner ("arbitrary") reduction axis -> acts as accumulator.
    i = pl.program_id(1)

    @pl.when(i == 0)
    def _():
        acc_ref[...] = jnp.zeros_like(acc_ref)

    d = x_ref[...].astype(jnp.float32) - t_ref[...].astype(jnp.float32)

    if need_mask:
        # Ragged tail: zero out rows past the real extent.  `need_mask` is a
        # trace-time constant, so aligned inputs pay nothing here.
        g = (pl.program_id(0) * inner + i) * tr
        row = jax.lax.broadcasted_iota(jnp.int32, d.shape, 0) + g
        d = jnp.where(row < valid_rows, d, 0.0)

    sq = d * d
    # Fold (tr, 128) down to (8, 128) with vreg-wise adds (pure VPU, no
    # per-step XLU reduce and no scalar SMEM dependency chain).
    folded = jnp.sum(sq.reshape(-1, _SUBLANES, _LANES), axis=0)
    acc_ref[...] += folded[None, :, :]

    # Fold the mean normalization into the final step of each shard.
    @pl.when(i == pl.num_programs(1) - 1)
    def _():
        acc_ref[...] = acc_ref[...] * inv_total


def content_loss_forward(x, target, *, tile_rows=8192, num_shards=2):
    """Returns (x, loss) where loss = mean((x - target)**2), like ContentLoss.forward."""
    assert x.shape == target.shape, "input / target shapes must match"
    total = x.size
    assert total > 0

    xf = x.reshape(-1)
    tf = target.reshape(-1)

    # Pad the flat view up to a multiple of 128 lanes only if needed
    # (zero padding in BOTH x and target => zero diff => no contribution).
    lane_pad = (-total) % _LANES
    if lane_pad:
        xf = jnp.pad(xf, (0, lane_pad))
        tf = jnp.pad(tf, (0, lane_pad))
    rows = (total + lane_pad) // _LANES

    x2 = xf.reshape(rows, _LANES)   # contiguous reshape: no copy
    t2 = tf.reshape(rows, _LANES)

    # Shard / tile sizing: pick the inner trip count from the max tile size
    # first, then back-solve the tile so wasted (masked) rows stay tiny.
    num_shards = max(1, min(int(num_shards), rows // _SUBLANES))
    rows_per_shard = -(-rows // num_shards)
    inner = max(1, -(-rows_per_shard // int(tile_rows)))
    tr = _round_up(-(-rows_per_shard // inner), _SUBLANES)

    grid_rows = num_shards * inner * tr
    need_mask = grid_rows != rows
    last_block = -(-rows // tr) - 1   # last block whose start is in-bounds

    kernel = functools.partial(
        _mse_partial_kernel,
        inv_total=1.0 / float(total),
        inner=inner,
        tr=tr,
        valid_rows=rows,
        need_mask=need_mask,
    )

    def in_map(s, i):
        # Clamp so a block start never points past the array; steps whose
        # nominal range is fully out of bounds are entirely masked in-kernel.
        return (jnp.minimum(s * inner + i, last_block), 0)

    out_bytes = num_shards * _SUBLANES * _LANES * 4
    partials = pl.pallas_call(
        kernel,
        out_shape=jax.ShapeDtypeStruct((num_shards, _SUBLANES, _LANES), jnp.float32),
        grid_spec=pltpu.PrefetchScalarGridSpec(
            num_scalar_prefetch=0,
            grid=(num_shards, inner),
            in_specs=[
                pl.BlockSpec((tr, _LANES), in_map),
                pl.BlockSpec((tr, _LANES), in_map),
            ],
            out_specs=pl.BlockSpec((1, _SUBLANES, _LANES), lambda s, i: (s, 0, 0)),
        ),
        compiler_params=pltpu.CompilerParams(
            dimension_semantics=("parallel", "arbitrary"),
            vmem_limit_bytes=32 * 1024 * 1024,
        ),
        cost_estimate=pl.CostEstimate(
            flops=3 * total,
            transcendentals=0,
            bytes_accessed=x.nbytes + target.nbytes + out_bytes,
        ),
    )(x2, t2)

    # Per-shard partials are already scaled by 1/total; tiny final reduce here.
    loss = jnp.sum(partials)
    # Module returns the input unchanged (identity passthrough).
    return x, loss


if __name__ == "__main__":
    key = jax.random.PRNGKey(0)
    kx, kt = jax.random.split(key)

    # NCHW feature-map-like shapes: batch=2, channels=4, spatial=16x16
    x = jax.random.normal(kx, (2, 4, 16, 16), dtype=jnp.float32)
    # "target" is a detached feature map captured at module construction time;
    # initialize it deterministically in-script.
    target = jax.random.normal(kt, (2, 4, 16, 16), dtype=jnp.float32)

    out, loss = content_loss_forward(x, target)
    out = jax.block_until_ready(out)
    loss = jax.block_until_ready(loss)

    ref_loss = jnp.mean((x - target) ** 2)
    assert jnp.allclose(loss, ref_loss, rtol=1e-5, atol=1e-6), (loss, ref_loss)
    assert jnp.array_equal(out, x)

    # Also exercise the masked / non-128-aligned path.
    kx2, kt2 = jax.random.split(jax.random.PRNGKey(1))
    x2 = jax.random.normal(kx2, (2, 3, 7, 9), dtype=jnp.float32)   # 378 elems
    t2 = jax.random.normal(kt2, (2, 3, 7, 9), dtype=jnp.float32)
    out2, loss2 = content_loss_forward(x2, t2)
    loss2 = jax.block_until_ready(loss2)
    ref_loss2 = jnp.mean((x2 - t2) ** 2)
    assert jnp.allclose(loss2, ref_loss2, rtol=1e-5, atol=1e-6), (loss2, ref_loss2)
    assert jnp.array_equal(out2, x2)

    # 128-aligned but tile-misaligned path (no padding copy, in-kernel mask).
    kx3, kt3 = jax.random.split(jax.random.PRNGKey(2))
    x3 = jax.random.normal(kx3, (3, 4, 8, 16), dtype=jnp.float32)  # 1536 elems
    t3 = jax.random.normal(kt3, (3, 4, 8, 16), dtype=jnp.float32)
    out3, loss3 = content_loss_forward(x3, t3)
    loss3 = jax.block_until_ready(loss3)
    ref_loss3 = jnp.mean((x3 - t3) ** 2)
    assert jnp.allclose(loss3, ref_loss3, rtol=1e-5, atol=1e-6), (loss3, ref_loss3)
    assert jnp.array_equal(out3, x3)

    print("KERNEL_OK")
</pallas_src>

<mosaic_0001>
module attributes {stable_mosaic.version = 11 : i64} {
  func.func @_mse_partial_kernel(%arg0: i32, %arg1: i32, %arg2: memref<8x128xf32, #tpu.memory_space<vmem>>, %arg3: memref<8x128xf32, #tpu.memory_space<vmem>>, %arg4: memref<1x8x128xf32, #tpu.memory_space<vmem>>) attributes {dimension_semantics = [#tpu.dimension_semantics<parallel>, #tpu.dimension_semantics<arbitrary>], iteration_bounds = array<i64: 2, 1>, scalar_prefetch = 0 : i64, scratch_operands = 0 : i64, tpu.core_type = #tpu.core_type<tc>, window_params = [{transform_indices = @transform_0, window_bounds = array<i64: 8, 128>}, {transform_indices = @transform_1, window_bounds = array<i64: 8, 128>}, {transform_indices = @transform_2, window_bounds = array<i64: 1, 8, 128>}]} {
    %c0_i32 = arith.constant 0 : i32
    %0 = arith.cmpi eq, %arg1, %c0_i32 : i32
    %1 = arith.extui %0 : i1 to i32
    %c0_i32_0 = arith.constant 0 : i32
    %2 = arith.cmpi ne, %1, %c0_i32_0 : i32
    scf.if %2 {
      %cst_12 = arith.constant 0.000000e+00 : f32
      %16 = vector.broadcast %cst_12 : f32 to vector<1x8x128xf32>
      %c0_13 = arith.constant 0 : index
      %c0_14 = arith.constant 0 : index
      %c0_15 = arith.constant 0 : index
      %17 = vector.load %arg4[%c0_13, %c0_14, %c0_15] : memref<1x8x128xf32, #tpu.memory_space<vmem>>, vector<1x8x128xf32>
      tpu.vector_store %arg4[%c0_13, %c0_14, %c0_15], %16 {strides = array<i32>} : memref<1x8x128xf32, #tpu.memory_space<vmem>>, vector<1x8x128xf32>,
    } else {
    }
    %c0 = arith.constant 0 : index
    %c0_1 = arith.constant 0 : index
    %3 = vector.load %arg2[%c0, %c0_1] : memref<8x128xf32, #tpu.memory_space<vmem>>, vector<8x128xf32>
    %c0_2 = arith.constant 0 : index
    %c0_3 = arith.constant 0 : index
    %4 = vector.load %arg3[%c0_2, %c0_3] : memref<8x128xf32, #tpu.memory_space<vmem>>, vector<8x128xf32>
    %5 = arith.subf %3, %4 : vector<8x128xf32>
    %6 = arith.mulf %5, %5 : vector<8x128xf32>
    %7 = vector.shape_cast %6 : vector<8x128xf32> to vector<1x8x128xf32>
    %cst = arith.constant dense<0.000000e+00> : vector<8x128xf32>
    %8 = vector.multi_reduction <add>, %7, %cst [0] : vector<1x8x128xf32> to vector<8x128xf32>
    %c0_4 = arith.constant 0 : index
    %c0_5 = arith.constant 0 : index
    %c0_6 = arith.constant 0 : index
    %9 = vector.load %arg4[%c0_4, %c0_5, %c0_6] : memref<1x8x128xf32, #tpu.memory_space<vmem>>, vector<1x8x128xf32>
    %10 = vector.shape_cast %8 : vector<8x128xf32> to vector<1x8x128xf32>
    %11 = arith.addf %9, %10 : vector<1x8x128xf32>
    %c0_7 = arith.constant 0 : index
    %c0_8 = arith.constant 0 : index
    %c0_9 = arith.constant 0 : index
    %12 = vector.load %arg4[%c0_7, %c0_8, %c0_9] : memref<1x8x128xf32, #tpu.memory_space<vmem>>, vector<1x8x128xf32>
    tpu.vector_store %arg4[%c0_7, %c0_8, %c0_9], %11 {strides = array<i32>} : memref<1x8x128xf32, #tpu.memory_space<vmem>>, vector<1x8x128xf32>,
    %c0_i32_10 = arith.constant 0 : i32
    %13 = arith.cmpi eq, %arg1, %c0_i32_10 : i32
    %14 = arith.extui %13 : i1 to i32
    %c0_i32_11 = arith.constant 0 : i32
    %15 = arith.cmpi ne, %14, %c0_i32_11 : i32
    scf.if %15 {
      %c0_12 = arith.constant 0 : index
      %c0_13 = arith.constant 0 : index
      %c0_14 = arith.constant 0 : index
      %16 = vector.load %arg4[%c0_12, %c0_13, %c0_14] : memref<1x8x128xf32, #tpu.memory_space<vmem>>, vector<1x8x128xf32>
      %cst_15 = arith.constant 4.8828125E-4 : f32
      %17 = vector.broadcast %cst_15 : f32 to vector<1x8x128xf32>
      %18 = arith.mulf %16, %17 : vector<1x8x128xf32>
      %c0_16 = arith.constant 0 : index
      %c0_17 = arith.constant 0 : index
      %c0_18 = arith.constant 0 : index
      %19 = vector.load %arg4[%c0_16, %c0_17, %c0_18] : memref<1x8x128xf32, #tpu.memory_space<vmem>>, vector<1x8x128xf32>
      tpu.vector_store %arg4[%c0_16, %c0_17, %c0_18], %18 {strides = array<i32>} : memref<1x8x128xf32, #tpu.memory_space<vmem>>, vector<1x8x128xf32>,
    } else {
    }
    return
  }
  func.func @transform_0(%arg0: i32, %arg1: i32) -> (i32, i32) {
    %c1_i32 = arith.constant 1 : i32
    %0 = arith.muli %arg0, %c1_i32 : i32
    %1 = arith.addi %0, %arg1 : i32
    %c1_i32_0 = arith.constant 1 : i32
    %2 = arith.minsi %1, %c1_i32_0 : i32
    %c0_i32 = arith.constant 0 : i32
    %c0_i32_1 = arith.constant 0 : i32
    return %2, %c0_i32 : i32, i32
  }
  func.func @transform_1(%arg0: i32, %arg1: i32) -> (i32, i32) {
    %c1_i32 = arith.constant 1 : i32
    %0 = arith.muli %arg0, %c1_i32 : i32
    %1 = arith.addi %0, %arg1 : i32
    %c1_i32_0 = arith.constant 1 : i32
    %2 = arith.minsi %1, %c1_i32_0 : i32
    %c0_i32 = arith.constant 0 : i32
    %c0_i32_1 = arith.constant 0 : i32
    return %2, %c0_i32 : i32, i32
  }
  func.func @transform_2(%arg0: i32, %arg1: i32) -> (i32, i32, i32) {
    %c0_i32 = arith.constant 0 : i32
    %c0_i32_0 = arith.constant 0 : i32
    %c0_i32_1 = arith.constant 0 : i32
    return %arg0, %c0_i32, %c0_i32_0 : i32, i32, i32
  }
}

</mosaic_0001>

<bundles_post_ra>
// kernel: tpu_custom_call.1
= control target key start
LH: loop header
LB: loop body
LE: loop exit
PB: predicated region body
PF: predicated region fallthrough
CT: control target
= control target key end

     0   :  { %s826_s0 = inlined_call_operand.hbm [shape: f32[16,128], index: 0, kind: input, shape index: {}]   ;;  %s827_s1 = inlined_call_operand.hbm [shape: f32[16,128], index: 1, kind: input, shape index: {}]   ;;  %s828_s2 = inlined_call_operand.hbm [shape: f32[2,8,128], index: 2, kind: output, shape index: {}]  }
   0x1   :  { %831 = sst [smem:[#allocation13_spill]] %s826_s0 }
   0x2   :  { %7 = vsyncpa [#allocation3], 0 }
   0x3   :  { %9 = vsyncpa [#allocation3 + $0x1], 0 }
   0x4   :  { %10 = vsyncpa [#allocation6], 0 }
   0x5   :  { %12 = vsyncpa [#allocation6 + $0x1], 0 }
   0x6   :  { %13 = vsyncpa [#allocation4], 0 }
   0x7   :  { %15 = vsyncpa [#allocation4 + $0x1], 0  ;;  %s667_s9 = smov 0   ;;  %s669_s10 = smov 0  }
   0x8   :  { %s671_s11 = smov 0   ;;  %s673_s12 = smov 0  }
   0x9   :  { %s675_s13 = smov 0   ;;  %s677_s14 = smov 0  }
   0xa   :  { %s679_s15 = smov 0   ;;  %s681_s16 = smov 0  }
   0xb   :  { %s683_s17 = smov 0  }
   0xc LB: > { %832 = sst [smem:[#allocation11_spill]] %s646_s16  ;;  %s372_s18 = sadd.s32 4294967295, %s650_s17   ;;  %s650_s17 = sphi %s683_s17, %s21_s17   ;;  %s646_s16 = sphi %s681_s16, %s840_s16   ;;  %s642_s15 = sphi %s679_s15, %s839_s15   ;;  %s638_s14 = sphi %s677_s14, %s846_s14   ;;  %s634_s13 = sphi %s675_s13, %s845_s13   ;;  %s630_s12 = sphi %s673_s12, %s844_s12   ;;  %s626_s11 = sphi %s671_s11, %s843_s11   ;;  %s622_s10 = sphi %s669_s10, %s842_s10   ;;  %s618_s9 = sphi %s667_s9, %s841_s9  }
   0xd   : > { %s373_s19 = sadd.s32 4294967294, %s650_s17   ;;  %s33_s20 = sadd.s32 1, %s646_s16 }
   0xe   : > { %p38_p0 = scmp.lt.s32.totalorder %s646_s16, 1  ;;  %p35_p1 = scmp.ge.s32.totalorder %s33_s20, 2 }
   0xf   : > { %s46_s21 = sadd.s32 1, %s638_s14  ;;  %p53_p2 = scmp.ne.s32.totalorder %s638_s14, %s634_s13 }
  0x10   : > { %s716_s22 = scalar_select %p38_p0, %s646_s16, 1 }
  0x11   : > { %s848_s20 = smov (%p35_p1, %s33_s20), 0  ;;  %p54_p3 = scmp.eq.s32.totalorder %s650_s17, 0 }
  0x12   : > { %833 = sst [smem:[#allocation12_spill]] %s848_s20  ;;  %p41_p4 = scmp.lt.s32.totalorder %s848_s20, 1 }
  0x13   : > { %p59_p5 = scmp.ne.s32.totalorder %s634_s13, %s630_s12  ;;  %p725_p6 = por %p54_p3, %p53_p2 }
  0x14   : > { %p60_p7 = scmp.eq.s32.totalorder %s372_s18, 0  ;;  %s101_s26 = ssub.s32 %s646_s16, %s848_s20 }
  0x15   : > { %s42_s24 = scalar_select %p41_p4, %s848_s20, 1 }
  0x16   : > { %p730_p8 = por %p60_p7, %p59_p5  ;;  %p102_p9 = scmp.eq.s32.totalorder %s101_s26, 0 }
  0x17   : > { %s43_s27 = ssub.s32 %s716_s22, %s42_s24  ;;  %s104_s28 = sadd.s32 1, %s626_s11 }
  0x18   : > { %p44_p10 = scmp.eq.s32.totalorder %s43_s27, 0  ;;  %p114_p11 = scmp.ne.s32.totalorder %s626_s11, %s622_s10 }
  0x19   : > { %s739_s29 = scalar_select %p102_p9, %s626_s11, %s104_s28  }
  0x1a   : > { %s742_s30 = scalar_select %p44_p10, %s638_s14, %s46_s21  }
  0x1b   : > { %p115_p12 = scmp.eq.s32.totalorder %s372_s18, 1  ;;  %p120_p13 = scmp.ne.s32.totalorder %s622_s10, %s618_s9 }
  0x1c   : > { %p121_p0 = scmp.eq.s32.totalorder %s373_s19, 1  ;;  %p375_p2 = scmp.ge.s32.totalorder %s650_s17, 2 }
  0x1d   : > { %p748_p1 = por %p115_p12, %p114_p11  ;;  %p405_p4 = scmp.lt.s32.totalorder %s650_s17, 2 }
  0x1e   : > { %p753_p3 = por %p121_p0, %p120_p13  ;;  %s141_s5 = sand.u32 1, %s638_s14  }
  0x1f   : > { %s377_s6 = sshll.u32 %s716_s22, 3  ;;  %s376_s7 = sshll.u32 %s141_s5, 3 }
  0x20   : > { %s838_s0 = sld [smem:[#allocation13_spill]]  ;;  %s145_s19 = scalar_lea.vmem [#allocation2], %s376_s7 }
  0x21   : > { %s156_s24 = sshll.u32 %s145_s19, 4  ;;  %p395_p5 = pnand %p405_p4, %p725_p6  ;;  %s157_s24 = int_to_ptr.vmem [resolvable:$true] %s156_s24 }
  0x22   : > { %p380_p7 = scmp.ge.s32.totalorder %s650_s17, 1  ;;  %p183_p9 = scmp.lt.s32.totalorder %s650_s17, 3 }
  0x23   : > { %s142_s26 = scalar_lea.sflag [#allocation3], %s141_s5  ;;  %s174_s22 = scalar_lea.hbm %s827_s1, %s377_s6 }
  0x24   : > { %p184_p10 = pnand %p380_p7, %p183_p9  ;;  %s176_s20 = sshll.u32 %s174_s22, 4  ;;  %s177_s20 = int_to_ptr.hbm [resolvable:$true] %s176_s20 }
  0x25   : > { %s167_s16 = scalar_lea.vmem [#allocation5], %s376_s7  ;;  %s164_s12 = scalar_lea.sflag [#allocation6], %s141_s5 }
  0x26   : > { %s152_s18 = scalar_lea.hbm %s838_s0, %s377_s6  ;;  %s178_s8 = sshll.u32 %s167_s16, 4  ;;  %s179_s8 = int_to_ptr.vmem [resolvable:$true] %s178_s8 }
  0x27   : > { %s154_s21 = sshll.u32 %s152_s18, 4  ;;  %187 = sbr.rel (%p184_p10) target bundleno = 64 (0x40), region = 28  ;;  %s155_s21 = int_to_ptr.hbm [resolvable:$true] %s154_s21 }
  0x28   : > { %397 = dma.hbm_to_vmem [thread:$0]  (!%p395_p5), %s155_s21, 128, %s157_s24, %s142_s26  }
  0x29   : > { %400 = dma.hbm_to_vmem [thread:$0]  (!%p395_p5), %s177_s20, 128, %s179_s8, %s164_s12  }
  0x2a   : > { %s189_s23 = sand.u32 (!%p184_p10), 1, %s634_s13  }
  0x2b   : > { %s381_s18 = sshll.u32 (!%p184_p10), %s189_s23, 3  ;;  %s190_s19 = scalar_lea.sflag (!%p184_p10), [#allocation3], %s189_s23 }
  0x2c   : > { %s193_s0 = scalar_lea.vmem [#allocation2], %s381_s18 }
  0x2d   : > { %605 = dma.done.wait (%p730_p8), %s190_s19, 128  }
  0x2e   : > { %607 = vsyncadd (%p730_p8), %s190_s19, 4294967168  ;;  %s200_s6 = scalar_lea.sflag [#allocation6], %s189_s23  ;;  %s203_s7 = scalar_lea.vmem [#allocation5], %s381_s18 }
  0x2f   : > { %609 = dma.done.wait (%p730_p8), %s200_s6, 128  }
  0x30   : > { %611 = vsyncadd (%p730_p8), %s200_s6, 4294967168  ;;  %s227_s16 = sand.u32 1, %s622_s10   ;;  %s385_s5 = sshll.u32 %s642_s15, 3  ;;  %v241_v0 = vld [vmem:[%s193_s0] sm:$0xff]  ;;  %v242_v1 = vld [vmem:[%s203_s7] sm:$0xff] }
  0x31   : > { %s383_s20 = sshll.u32 %s227_s16, 3  ;;  %v243_v2 = vsub.f32 %v241_v0, %v242_v1  ;;  %s266_s26 = scalar_lea.hbm %s828_s2, %s385_s5 }
  0x32   : > { %s229_s27 = scalar_lea.vmem [#allocation7], %s383_s20  ;;  %s270_s22 = sshll.u32 %s266_s26, 4  ;;  %s271_s22 = int_to_ptr.hbm [resolvable:$true] %s270_s22 }
  0x33   : > { %v244_v3 = vmul.f32 %v243_v2, %v243_v2  ;;  %s268_s28 = sshll.u32 %s229_s27, 4  ;;  %s256_s25 = scalar_lea.sflag [#allocation4], %s227_s16  ;;  %s269_s28 = int_to_ptr.vmem [resolvable:$true] %s268_s28 }
  0x34   : > { %s554_s8 = sshra.s32 %s271_s22, 4  ;;  %s560_s23 = scalar_lea.hbm %s828_s2, 16  ;;  %s555_s8 = int_to_ptr.hbm [resolvable:$true] %s554_s8 }
  0x35   : > { %v253_v4 = vmul.f32 0.00048828125, %v244_v3  ;;  %s556_s15 = scalar_lea.hbm %s555_s8, 8  ;;  %p561_p12 = scmp.lt.s32.totalorder %s555_s8, %s828_s2 }
  0x36   : > { %p557_p6 = scmp.ne.s32.totalorder %s555_s8, %s556_s15  ;;  %p562_p13 = scmp.lt.s32.totalorder %s560_s23, %s556_s15 }
  0x37   : > { %254 = vst [vmem:[%s229_s27] sm:$0xff] %v253_v4 }
  0x38   : > { %p558_p8 = pnand %p557_p6, %p748_p1  ;;  %p563_p0 = por %p562_p13, %p561_p12 }
  0x3a   : > { %p559_p11 = pneg %p558_p8 }
  0x3c   : > { %p564_p4 = pnand %p563_p0, %p559_p11 }
  0x3e   : > { %567 = shalt.err (!%p564_p4)
}
  0x3f   : > { %392 = dma.vmem_to_hbm [thread:$0]  (%p748_p1), %s269_s28, 128, %s271_s22, %s256_s25  }
  0x40 PF: > { %s282_s6 = sand.u32 1, %s618_s9   ;;  %p402_p5 = pnand %p375_p2, %p753_p3 }
  0x41   : > { %s283_s7 = scalar_lea.sflag [#allocation4], %s282_s6 }
  0x42   : > { %p403_p7 = pneg %p402_p5 }
  0x44   : > { %613 = dma.done.wait (%p403_p7), %s283_s7, 128  }
  0x45   : > { %615 = vsyncadd (%p403_p7), %s283_s7, 4294967168  ;;  %s21_s17 = sadd.s32 1, %s650_s17   ;;  %s839_s15 = sld [smem:[#allocation11_spill]] }
  0x46   : > { %p18_p9 = scmp.ge.s32.totalorder %s21_s17, 4   ;;  %s840_s16 = sld [smem:[#allocation12_spill]] }
  0x47   : > { %s841_s9 = smov %s622_s10  ;;  %s842_s10 = smov %s626_s11 }
  0x48   : > { %s843_s11 = smov %s739_s29  ;;  %s844_s12 = smov %s634_s13 }
  0x49   : > { %s845_s13 = smov %s638_s14  ;;  %s846_s14 = smov %s742_s30 }
  0x4a   :  { %20 = sbr.rel (!%p18_p9) target bundleno = 12 (0xc), region = 94 }
  0x4f   :  { %289 = vsyncpa [#allocation3], 1 }
  0x50   :  { %291 = vsyncpa [#allocation3 + $0x1], 1 }
  0x51   :  { %292 = vsyncpa [#allocation6], 1 }
  0x52   :  { %294 = vsyncpa [#allocation6 + $0x1], 1 }
  0x53   :  { %295 = vsyncpa [#allocation4], 1 }
  0x54   :  { %297 = vsyncpa [#allocation4 + $0x1], 1 }

</bundles_post_ra>
